<compile_context>
chip_gen: v5e
topology: v5e:2x2
jax: 0.10.0
libtpu: 0.0.40
codegen_flags: <defaults>
</compile_context>

<pallas_src>
import math

import jax
import jax.numpy as jnp
from jax.experimental import pallas as pl
from jax.experimental.pallas import tpu as pltpu


def _ffn_kernel(x_ref, w1_ref, b1_ref, w2_ref, b2_ref, o_ref):
    # x_ref:  (TM, input_dim)   tile of flattened rows
    # w1_ref: (input_dim, d_ff)   resident across grid steps
    # b1_ref: (1, d_ff)
    # w2_ref: (d_ff, d_model)     resident across grid steps
    # b2_ref: (1, d_model)
    # o_ref:  (TM, d_model)
    x = x_ref[...]

    # Linear 1 (MXU, f32 accumulation) + bias + ReLU (VPU).
    h = jnp.dot(x, w1_ref[...], preferred_element_type=jnp.float32)
    h = jnp.maximum(h + b1_ref[...].astype(jnp.float32), 0.0)

    # Linear 2 (MXU, f32 accumulation) + bias.
    y = jnp.dot(h.astype(w2_ref.dtype), w2_ref[...],
                preferred_element_type=jnp.float32)
    y = y + b2_ref[...].astype(jnp.float32)

    o_ref[...] = y.astype(o_ref.dtype)


def _round_up(x, m):
    return ((x + m - 1) // m) * m


def feed_forward(x, W1, b1, W2, b2, *, row_tile=256):
    """Pallas equivalent of FeedForwardNetwork.forward.

    x:  [..., input_dim]
    W1: [input_dim, d_ff]   (== torch layer1.weight.T)
    b1: [d_ff]
    W2: [d_ff, d_model]     (== torch layer2.weight.T)
    b2: [d_model]
    returns [..., d_model]
    """
    input_dim, d_ff = W1.shape
    d_model = W2.shape[1]
    leading = x.shape[:-1]
    M = math.prod(leading) if leading else 1

    # Flatten all leading dims into rows -> better sublane utilization and one
    # grid axis to tile / parallelize over.
    x2 = x.reshape(M, input_dim)
    b1_2 = b1.reshape(1, d_ff)
    b2_2 = b2.reshape(1, d_model)

    # Row tile: whole problem in one step when tiny, otherwise a sublane-aligned
    # tile that keeps the per-step working set bounded (fits the default scoped
    # VMEM limit comfortably, incl. v7x's smaller 64 MiB VMEM).
    TM = min(row_tile, _round_up(M, 8))
    M_pad = _round_up(M, TM)
    if M_pad != M:
        x2 = jnp.pad(x2, ((0, M_pad - M), (0, 0)))

    grid = (M_pad // TM,)

    out = pl.pallas_call(
        _ffn_kernel,
        out_shape=jax.ShapeDtypeStruct((M_pad, d_model), x.dtype),
        grid_spec=pltpu.PrefetchScalarGridSpec(
            num_scalar_prefetch=0,
            grid=grid,
            in_specs=[
                pl.BlockSpec((TM, input_dim), lambda i: (i, 0)),     # x rows
                pl.BlockSpec((input_dim, d_ff), lambda i: (0, 0)),   # W1 (resident)
                pl.BlockSpec((1, d_ff), lambda i: (0, 0)),           # b1
                pl.BlockSpec((d_ff, d_model), lambda i: (0, 0)),     # W2 (resident)
                pl.BlockSpec((1, d_model), lambda i: (0, 0)),        # b2
            ],
            out_specs=pl.BlockSpec((TM, d_model), lambda i: (i, 0)),
        ),
        compiler_params=pltpu.CompilerParams(
            # Row tiles are fully independent -> shard across TCs on v7x.
            dimension_semantics=("parallel",),
        ),
    )(x2, W1, b1_2, W2, b2_2)

    if M_pad != M:
        out = out[:M]
    return out.reshape(*leading, d_model)


def _reference(x, W1, b1, W2, b2):
    hp = jax.lax.Precision.HIGHEST
    h = jnp.maximum(jnp.dot(x, W1, precision=hp) + b1, 0.0)
    return jnp.dot(h, W2, precision=hp) + b2


if __name__ == "__main__":
    # Small shapes consistent with the module:
    #   x: [batch=2, seq=8, input_dim=32],  d_ff=64, d_model=32
    batch, seq = 2, 8
    input_dim, d_ff, d_model = 32, 64, 32

    key = jax.random.PRNGKey(0)
    kx, k1, kb1, k2, kb2 = jax.random.split(key, 5)

    # torch.nn.Linear-style uniform init, stored already transposed ([in, out]).
    bound1 = 1.0 / math.sqrt(input_dim)
    bound2 = 1.0 / math.sqrt(d_ff)
    W1 = jax.random.uniform(k1, (input_dim, d_ff), jnp.float32, -bound1, bound1)
    b1 = jax.random.uniform(kb1, (d_ff,), jnp.float32, -bound1, bound1)
    W2 = jax.random.uniform(k2, (d_ff, d_model), jnp.float32, -bound2, bound2)
    b2 = jax.random.uniform(kb2, (d_model,), jnp.float32, -bound2, bound2)

    x = jax.random.normal(kx, (batch, seq, input_dim), dtype=jnp.float32)

    out = jax.block_until_ready(feed_forward(x, W1, b1, W2, b2))
    ref = _reference(x, W1, b1, W2, b2)

    assert out.shape == (batch, seq, d_model)
    assert jnp.allclose(out, ref, atol=1e-4, rtol=1e-4)

    print("KERNEL_OK")
</pallas_src>

<mosaic_0001>
module attributes {stable_mosaic.version = 11 : i64} {
  func.func @_ffn_kernel(%arg0: i32, %arg1: memref<16x32xf32, #tpu.memory_space<vmem>>, %arg2: memref<32x64xf32, #tpu.memory_space<vmem>>, %arg3: memref<1x64xf32, #tpu.memory_space<vmem>>, %arg4: memref<64x32xf32, #tpu.memory_space<vmem>>, %arg5: memref<1x32xf32, #tpu.memory_space<vmem>>, %arg6: memref<16x32xf32, #tpu.memory_space<vmem>>) attributes {dimension_semantics = [#tpu.dimension_semantics<parallel>], iteration_bounds = array<i64: 1>, scalar_prefetch = 0 : i64, scratch_operands = 0 : i64, tpu.core_type = #tpu.core_type<tc>, window_params = [{transform_indices = @transform_0, window_bounds = array<i64: 16, 32>}, {pipeline_mode = #tpu.pipeline_mode<synchronous>, transform_indices = @transform_1, window_bounds = array<i64: 32, 64>}, {pipeline_mode = #tpu.pipeline_mode<synchronous>, transform_indices = @transform_2, window_bounds = array<i64: 1, 64>}, {pipeline_mode = #tpu.pipeline_mode<synchronous>, transform_indices = @transform_3, window_bounds = array<i64: 64, 32>}, {pipeline_mode = #tpu.pipeline_mode<synchronous>, transform_indices = @transform_4, window_bounds = array<i64: 1, 32>}, {transform_indices = @transform_5, window_bounds = array<i64: 16, 32>}]} {
    %c0 = arith.constant 0 : index
    %c0_0 = arith.constant 0 : index
    %0 = vector.load %arg1[%c0, %c0_0] : memref<16x32xf32, #tpu.memory_space<vmem>>, vector<16x32xf32>
    %c0_1 = arith.constant 0 : index
    %c0_2 = arith.constant 0 : index
    %1 = vector.load %arg2[%c0_1, %c0_2] : memref<32x64xf32, #tpu.memory_space<vmem>>, vector<32x64xf32>
    %cst = arith.constant dense<0.000000e+00> : vector<16x64xf32>
    %2 = tpu.matmul %0, %1, %cst {dimension_numbers = #tpu.dot_dimension_numbers<[1], [0], [0], [1], [0, 0, 1, 1], [], []>} : vector<16x32xf32>, vector<32x64xf32>, vector<16x64xf32> -> vector<16x64xf32>
    %c0_3 = arith.constant 0 : index
    %c0_4 = arith.constant 0 : index
    %3 = vector.load %arg3[%c0_3, %c0_4] : memref<1x64xf32, #tpu.memory_space<vmem>>, vector<1x64xf32>
    %4 = vector.broadcast %3 : vector<1x64xf32> to vector<16x64xf32>
    %5 = arith.addf %2, %4 : vector<16x64xf32>
    %cst_5 = arith.constant 0.000000e+00 : f32
    %6 = vector.broadcast %cst_5 : f32 to vector<16x64xf32>
    %7 = arith.maximumf %5, %6 : vector<16x64xf32>
    %c0_6 = arith.constant 0 : index
    %c0_7 = arith.constant 0 : index
    %8 = vector.load %arg4[%c0_6, %c0_7] : memref<64x32xf32, #tpu.memory_space<vmem>>, vector<64x32xf32>
    %cst_8 = arith.constant dense<0.000000e+00> : vector<16x32xf32>
    %9 = tpu.matmul %7, %8, %cst_8 {dimension_numbers = #tpu.dot_dimension_numbers<[1], [0], [0], [1], [0, 0, 1, 1], [], []>} : vector<16x64xf32>, vector<64x32xf32>, vector<16x32xf32> -> vector<16x32xf32>
    %c0_9 = arith.constant 0 : index
    %c0_10 = arith.constant 0 : index
    %10 = vector.load %arg5[%c0_9, %c0_10] : memref<1x32xf32, #tpu.memory_space<vmem>>, vector<1x32xf32>
    %11 = vector.broadcast %10 : vector<1x32xf32> to vector<16x32xf32>
    %12 = arith.addf %9, %11 : vector<16x32xf32>
    %c0_11 = arith.constant 0 : index
    %c0_12 = arith.constant 0 : index
    %13 = vector.load %arg6[%c0_11, %c0_12] : memref<16x32xf32, #tpu.memory_space<vmem>>, vector<16x32xf32>
    tpu.vector_store %arg6[%c0_11, %c0_12], %12 {strides = array<i32>} : memref<16x32xf32, #tpu.memory_space<vmem>>, vector<16x32xf32>,
    return
  }
  func.func @transform_0(%arg0: i32) -> (i32, i32) {
    %c0_i32 = arith.constant 0 : i32
    %c0_i32_0 = arith.constant 0 : i32
    return %arg0, %c0_i32 : i32, i32
  }
  func.func @transform_1(%arg0: i32) -> (i32, i32) {
    %c0_i32 = arith.constant 0 : i32
    %c0_i32_0 = arith.constant 0 : i32
    %c0_i32_1 = arith.constant 0 : i32
    return %c0_i32, %c0_i32_0 : i32, i32
  }
  func.func @transform_2(%arg0: i32) -> (i32, i32) {
    %c0_i32 = arith.constant 0 : i32
    %c0_i32_0 = arith.constant 0 : i32
    %c0_i32_1 = arith.constant 0 : i32
    return %c0_i32, %c0_i32_0 : i32, i32
  }
  func.func @transform_3(%arg0: i32) -> (i32, i32) {
    %c0_i32 = arith.constant 0 : i32
    %c0_i32_0 = arith.constant 0 : i32
    %c0_i32_1 = arith.constant 0 : i32
    return %c0_i32, %c0_i32_0 : i32, i32
  }
  func.func @transform_4(%arg0: i32) -> (i32, i32) {
    %c0_i32 = arith.constant 0 : i32
    %c0_i32_0 = arith.constant 0 : i32
    %c0_i32_1 = arith.constant 0 : i32
    return %c0_i32, %c0_i32_0 : i32, i32
  }
  func.func @transform_5(%arg0: i32) -> (i32, i32) {
    %c0_i32 = arith.constant 0 : i32
    %c0_i32_0 = arith.constant 0 : i32
    return %arg0, %c0_i32 : i32, i32
  }
}

</mosaic_0001>

<bundles_post_ra>
// kernel: tpu_custom_call.1
= control target key start
LH: loop header
LB: loop body
LE: loop exit
PB: predicated region body
PF: predicated region fallthrough
CT: control target
= control target key end

     0   :  { %s260_s0 = inlined_call_operand.vmem [shape: f32[16,32], index: 0, kind: input, shape index: {}]   ;;  %s261_s1 = inlined_call_operand.vmem [shape: f32[32,64], index: 1, kind: input, shape index: {}]   ;;  %s262_s2 = inlined_call_operand.vmem [shape: f32[1,64], index: 2, kind: input, shape index: {}]   ;;  %s263_s3 = inlined_call_operand.vmem [shape: f32[64,32], index: 3, kind: input, shape index: {}]   ;;  %s264_s4 = inlined_call_operand.vmem [shape: f32[1,32], index: 4, kind: input, shape index: {}]   ;;  %s265_s5 = inlined_call_operand.hbm [shape: f32[16,32], index: 5, kind: output, shape index: {}]  }
   0x1   :  { %v26_v0 = vld [vmem:[%s261_s1 + $0x18] sm:$0xff]  ;;  %v25_v1 = vld [vmem:[%s261_s1 + $0x10] sm:$0xff]  ;;  %v24_v2 = vld [vmem:[%s261_s1 + $0x8] sm:$0xff] }
   0x2   :  { %129 = vmatpush.msra.mxu3 %v26_v0  ;;  %50 = vmatpush.msra.mxu0 %v26_v0  ;;  %v70_v3 = vld [vmem:[%s263_s3 + $0x38] sm:$0xff]  ;;  %v69_v4 = vld [vmem:[%s263_s3 + $0x30] sm:$0xff]  ;;  %v23_v5 = vld [vmem:[%s261_s1] sm:$0xff] }
   0x3   :  { %133 = vmatpush.msra.mxu2 %v70_v3  ;;  %90 = vmatpush.msra.mxu1 %v70_v3 }
   0x4   :  { %130 = vmatpush.msra.mxu3 %v25_v1  ;;  %51 = vmatpush.msra.mxu0 %v25_v1 }
   0x5   :  { %10 = vsyncpa [#allocation3], 0  ;;  %v22_v6 = vld [vmem:[%s260_s0 + $0x8] sm:$0xff]  ;;  %vm31_vm0 = vcmask 261120   ;;  %v21_v7 = vld [vmem:[%s260_s0] sm:$0xff]  ;;  %134 = vmatpush.msra.mxu2 %v69_v4  ;;  %91 = vmatpush.msra.mxu1 %v69_v4  ;;  %vm75_vm1 = vcmask 523264  }
   0x6   :  { %131 = vmatpush.msra.mxu3 %v24_v2  ;;  %52 = vmatpush.msra.mxu0 %v24_v2  ;;  %v68_v8 = vld [vmem:[%s263_s3 + $0x28] sm:$0xff]  ;;  %v67_v9 = vld [vmem:[%s263_s3 + $0x20] sm:$0xff]  ;;  %v66_v10 = vld [vmem:[%s263_s3 + $0x18] sm:$0xff]  ;;  %s113_s25 = sshll.u32 %s265_s5, 4  ;;  %s173_s26 = smov 128   ;;  %s114_s25 = int_to_ptr.hbm [resolvable:$true] %s113_s25 }
   0x7   :  { %135 = vmatpush.msra.mxu2 %v68_v8  ;;  %92 = vmatpush.msra.mxu1 %v68_v8  ;;  %v65_v11 = vld [vmem:[%s263_s3 + $0x10] sm:$0xff]  ;;  %v64_v12 = vld [vmem:[%s263_s3 + $0x8] sm:$0xff]  ;;  %v63_v13 = vld [vmem:[%s263_s3] sm:$0xff]  ;;  %s172_s3 = smov [#allocation2]   ;;  %s174_s27 = smov 8  }
   0x8   :  { %132 = vmatpush.msra.mxu3 %v23_v5  ;;  %53 = vmatpush.msra.mxu0 %v23_v5  ;;  %v144_v14 = vld [vmem:[%s262_s2] ss:$0 sm:$0xff]  ;;  %s111_s23 = sshll.u32 %s172_s3, 4  ;;  %s112_s23 = int_to_ptr.vmem [resolvable:$true] %s111_s23 }
   0x9   :  { %126 = vmatmul.msk.f32.vlgmr.msra.gmra.mxu3 %vm31_vm0, %v22_v6  ;;  %125 = vmatmul.msk.f32.vlgmr.msra.gmra.mxu0 %vm31_vm0, %v21_v7  ;;  %v145_v21 = vld [vmem:[%s264_s4] ss:$0 sm:$0xff] }
   0xa   :  { %136 = vmatpush.msra.mxu2 %v67_v9  ;;  %93 = vmatpush.msra.mxu1 %v67_v9 }
   0xc   :  { %137 = vmatpush.msra.mxu2 %v66_v10  ;;  %94 = vmatpush.msra.mxu1 %v66_v10 }
   0xe   :  { %138 = vmatpush.msra.mxu2 %v65_v11  ;;  %95 = vmatpush.msra.mxu1 %v65_v11 }
  0x10   :  { %139 = vmatpush.msra.mxu2 %v64_v12  ;;  %96 = vmatpush.msra.mxu1 %v64_v12 }
  0x12   :  { %140 = vmatpush.msra.mxu2 %v63_v13  ;;  %97 = vmatpush.msra.mxu1 %v63_v13 }
  0x86   :  { %v55_v15 = vpop.f32.mrf.mxu0 }
  0x87   :  { %v56_v16 = vadd.f32 %v144_v14, %v55_v15 }
  0x89   :  { %v61_v17 = vmax.f32 %v56_v16, 0.0 }
  0x8b   :  { %127 = vmatmul.msk.f32.vlgmr.msra.gmra.mxu1 %vm75_vm1, %v61_v17 }
  0x8c   :  { %v58_v18 = vpop.f32.mrf.mxu3 }
  0x8d   :  { %v59_v19 = vadd.f32 %v144_v14, %v58_v18 }
  0x8f   :  { %v62_v20 = vmax.f32 %v59_v19, 0.0 }
  0x91   :  { %128 = vmatmul.msk.f32.vlgmr.msra.gmra.mxu2 %vm75_vm1, %v62_v20 }
 0x108   :  { %v99_v22 = vpop.f32.mrf.mxu1 }
 0x109   :  { %v100_v23 = vadd.f32 %v145_v21, %v99_v22 }
 0x10b   :  { %105 = vst.msk [vmem:[#allocation2] sm:$0xff] %vm31_vm0, %v100_v23 }
 0x114   :  { %v102_v24 = vpop.f32.mrf.mxu2 }
 0x115   :  { %v103_v25 = vadd.f32 %v145_v21, %v102_v24 }
 0x117   :  { %106 = vst.msk [vmem:[#allocation2 + $0x8] sm:$0xff] %vm31_vm0, %v103_v25 }
 0x118   :  { %119 = dma.vmem_to_hbm [thread:$0]  %s112_s23, 256, %s114_s25, [#allocation3], %s173_s26, %s173_s26, %s174_s27  }
 0x119   :  { %170 = dma.done.wait [#allocation3], 256  }
 0x11a   :  { %171 = vsyncadd [#allocation3], 4294967040 }
 0x11b   :  { %124 = vsyncpa [#allocation3], 1 }

</bundles_post_ra>
